<compile_context>
chip_gen: v7x
topology: tpu7x:2x2x1
jax: 0.10.0
libtpu: 0.0.40
codegen_flags: <defaults>
</compile_context>

<pallas_src>
import math
from copy import copy

import jax
import jax.numpy as jnp
import numpy as np
from jax.experimental import pallas as pl
from jax.experimental.pallas import tpu as pltpu


def _cdiv(a, b):
    return -(-a // b)


def _round_up(x, m):
    return _cdiv(x, m) * m


# --------------------------------------------------------------------------- #
# Kernel
# --------------------------------------------------------------------------- #
def _expand_kernel(task_ref, sub_ref, e_rep_ref, e_til_ref, out_ref):
    """out = (task @ E_rep) * (subgoal @ E_til); one lane-dense full-tile store.

    E_rep / E_til are constant 0/1 expansion matrices (block-diagonal when
    samples are lane-packed), so the replicate/tile work runs on the MXU and
    the VPU only does one multiply + one cast per output element.
    """
    t = task_ref[...].astype(jnp.float32)
    s = sub_ref[...].astype(jnp.float32)
    rep = jnp.dot(t, e_rep_ref[...],
                  precision=jax.lax.Precision.HIGHEST,
                  preferred_element_type=jnp.float32)
    til = jnp.dot(s, e_til_ref[...],
                  precision=jax.lax.Precision.HIGHEST,
                  preferred_element_type=jnp.float32)
    out_ref[...] = (rep * til).astype(out_ref.dtype)


# --------------------------------------------------------------------------- #
# Wrapper helpers
# --------------------------------------------------------------------------- #
def _sublane_multiple(*dtypes):
    """Sublane rounding for the batch tile: 8 for f32, 16 for bf16, 32 for int8."""
    item = min(jnp.dtype(d).itemsize for d in dtypes)
    return max(8, 32 // item)


def _choose_pack_factor(n_out, n_task, n_sub):
    """Samples packed per row so the packed output width is a multiple of 128."""
    if n_out % 128 == 0:
        return 1
    k = 128 // math.gcd(n_out, 128)
    # Block-diagonal E footprint (f32): k^2 * n_out * (n_task + n_sub) * 4 bytes.
    e_bytes = k * k * n_out * (n_task + n_sub) * 4
    if k <= 16 and e_bytes <= (2 << 20):
        return k
    return 1   # fall back to masked stores; still MXU-based and correct.


def _choose_batch_tile(bp, per_row_bytes, e_bytes, sub_mult):
    """Batch tile (in packed rows): big enough to amortize per-step overhead,
    small enough to fit VMEM, and leaving >=4 grid steps when possible (v7x)."""
    budget = 10 << 20                       # in-kernel working-set target
    tb = (budget - e_bytes) // max(per_row_bytes, 1)
    tb = max(sub_mult, min(tb, 8192))
    tb = (tb // sub_mult) * sub_mult
    if bp > 4 * sub_mult:                   # keep both v7x TensorCores busy
        tb = min(tb, _round_up(_cdiv(bp, 4), sub_mult))
    if bp <= tb:
        return bp                           # block == full array is always legal
    return tb


# --------------------------------------------------------------------------- #
# Public entry points
# --------------------------------------------------------------------------- #
def expand_task_subgoal(task: jax.Array, subgoal: jax.Array) -> jax.Array:
    """(B, n_task), (B, n_subgoal) -> (B, n_task * n_subgoal) flattened outer product."""
    B, n_task = task.shape
    B2, n_sub = subgoal.shape
    assert B == B2, "batch dims must match"
    n_out = n_task * n_sub
    out_dtype = jnp.promote_types(task.dtype, subgoal.dtype)

    # --- lane packing: k samples per row so the output width is 128-lane dense.
    k = _choose_pack_factor(n_out, n_task, n_sub)
    b_pad = _round_up(B, k)
    if b_pad != B:
        task = jnp.pad(task, ((0, b_pad - B), (0, 0)))
        subgoal = jnp.pad(subgoal, ((0, b_pad - B), (0, 0)))
    bp = b_pad // k                         # packed rows
    kt, ks, W = k * n_task, k * n_sub, k * n_out
    task_p = task.reshape(bp, kt)           # free row-major reshapes
    sub_p = subgoal.reshape(bp, ks)

    # --- constant 0/1 expansion matrices (block-diagonal when k > 1).
    j = np.arange(n_out)
    e_rep = (j[None, :] // n_sub == np.arange(n_task)[:, None]).astype(np.float32)
    e_til = (j[None, :] % n_sub == np.arange(n_sub)[:, None]).astype(np.float32)
    if k > 1:
        eye = np.eye(k, dtype=np.float32)
        e_rep = np.kron(eye, e_rep)         # (k*n_task, k*n_out)
        e_til = np.kron(eye, e_til)         # (k*n_sub,  k*n_out)
    e_rep = jnp.asarray(e_rep)
    e_til = jnp.asarray(e_til)

    # --- tile sizing / VMEM accounting.
    t_item = jnp.dtype(task.dtype).itemsize
    s_item = jnp.dtype(subgoal.dtype).itemsize
    o_item = jnp.dtype(out_dtype).itemsize
    sub_mult = _sublane_multiple(task.dtype, subgoal.dtype, out_dtype)
    per_row = (2 * (kt * t_item + ks * s_item)   # double-buffered input tiles
               + (kt + ks) * 4                    # in-kernel f32 input casts
               + 2 * W * o_item                   # double-buffered output tile
               + 2 * W * 4)                       # rep / til f32 MXU results
    e_bytes = int((e_rep.size + e_til.size) * 4)
    tb = _choose_batch_tile(bp, per_row, e_bytes, sub_mult)
    grid = (_cdiv(bp, tb),)

    footprint = tb * per_row + e_bytes
    vmem_limit = int(min(32 << 20, max(2 * footprint, 8 << 20)))

    out_p = pl.pallas_call(
        _expand_kernel,
        out_shape=jax.ShapeDtypeStruct((bp, W), out_dtype),
        grid=grid,
        in_specs=[
            pl.BlockSpec((tb, kt), lambda i: (i, 0)),
            pl.BlockSpec((tb, ks), lambda i: (i, 0)),
            pl.BlockSpec((e_rep.shape[0], W), lambda i: (0, 0)),
            pl.BlockSpec((e_til.shape[0], W), lambda i: (0, 0)),
        ],
        out_specs=pl.BlockSpec((tb, W), lambda i: (i, 0)),
        compiler_params=pltpu.CompilerParams(
            dimension_semantics=("parallel",),
            vmem_limit_bytes=vmem_limit,
        ),
    )(task_p, sub_p, e_rep, e_til)

    out = out_p.reshape(b_pad, n_out)       # free reshape back
    if b_pad != B:
        out = out[:B]
    return out


def expand_task_subgoal_forward(x: dict) -> dict:
    """Dict-in / dict-out forward matching ExpandTaskSubgoal.forward."""
    y = copy(x)
    y['subgoal'] = expand_task_subgoal(x['task'], x['subgoal'])
    return y


def _reference(task, subgoal):
    # Pure-JAX reference of th.bmm(task[:, :, None], subgoal[:, None, :]).view(B, -1)
    return (task[:, :, None] * subgoal[:, None, :]).reshape(task.shape[0], -1)


if __name__ == "__main__":
    key = jax.random.PRNGKey(0)
    k_task, k_sub, k_other, k_t2, k_s2, k_t3, k_s3 = jax.random.split(key, 7)

    # --- Small demo matching the module's spaces: one-hot task + Box subgoal.
    #     n_out=32 -> lane-packed path (k=4, packed width 128).
    B, n_task, n_subgoal = 2, 4, 8
    task_idx = jax.random.randint(k_task, (B,), 0, n_task)
    task = jax.nn.one_hot(task_idx, n_task, dtype=jnp.float32)
    subgoal = jax.random.normal(k_sub, (B, n_subgoal), dtype=jnp.float32)
    other = jax.random.normal(k_other, (B, 3), dtype=jnp.float32)  # passthrough

    x = {'task': task, 'subgoal': subgoal, 'observation': other}
    y = expand_task_subgoal_forward(x)
    jax.block_until_ready(y['subgoal'])
    assert y['subgoal'].shape == (B, n_task * n_subgoal)
    assert jnp.allclose(y['subgoal'], _reference(task, subgoal), atol=1e-5, rtol=1e-5)
    assert y['task'] is x['task']
    assert y['observation'] is x['observation']

    # --- Padded lane-packed path (B not a multiple of k).
    B3 = 10
    task3 = jax.random.normal(k_t3, (B3, n_task), dtype=jnp.float32)
    sub3 = jax.random.normal(k_s3, (B3, n_subgoal), dtype=jnp.float32)
    out3 = expand_task_subgoal(task3, sub3)
    jax.block_until_ready(out3)
    assert jnp.allclose(out3, _reference(task3, sub3), atol=1e-5, rtol=1e-5)

    # --- Larger batch, awkward width (n_out=60 -> k=1 fallback), multi-step grid
    #     with a partial last block.
    B2n, nt2, ns2 = 2064, 6, 10
    task2 = jax.random.normal(k_t2, (B2n, nt2), dtype=jnp.float32)
    sub2 = jax.random.normal(k_s2, (B2n, ns2), dtype=jnp.float32)
    out2 = expand_task_subgoal(task2, sub2)
    jax.block_until_ready(out2)
    assert out2.shape == (B2n, nt2 * ns2)
    assert jnp.allclose(out2, _reference(task2, sub2), atol=1e-5, rtol=1e-5)

    print("KERNEL_OK")
</pallas_src>

<mosaic_0001>
module attributes {stable_mosaic.version = 11 : i64} {
  func.func @_expand_kernel(%arg0: i32, %arg1: memref<1x16xf32, #tpu.memory_space<vmem>>, %arg2: memref<1x32xf32, #tpu.memory_space<vmem>>, %arg3: memref<16x128xf32, #tpu.memory_space<vmem>>, %arg4: memref<32x128xf32, #tpu.memory_space<vmem>>, %arg5: memref<1x128xf32, #tpu.memory_space<vmem>>) attributes {dimension_semantics = [#tpu.dimension_semantics<parallel>], iteration_bounds = array<i64: 1>, scalar_prefetch = 0 : i64, scratch_operands = 0 : i64, tpu.core_type = #tpu.core_type<tc>, window_params = [{transform_indices = @transform_0, window_bounds = array<i64: 1, 16>}, {transform_indices = @transform_1, window_bounds = array<i64: 1, 32>}, {pipeline_mode = #tpu.pipeline_mode<synchronous>, transform_indices = @transform_2, window_bounds = array<i64: 16, 128>}, {pipeline_mode = #tpu.pipeline_mode<synchronous>, transform_indices = @transform_3, window_bounds = array<i64: 32, 128>}, {transform_indices = @transform_4, window_bounds = array<i64: 1, 128>}]} {
    %c0 = arith.constant 0 : index
    %c0_0 = arith.constant 0 : index
    %0 = vector.load %arg1[%c0, %c0_0] : memref<1x16xf32, #tpu.memory_space<vmem>>, vector<1x16xf32>
    %c0_1 = arith.constant 0 : index
    %c0_2 = arith.constant 0 : index
    %1 = vector.load %arg2[%c0_1, %c0_2] : memref<1x32xf32, #tpu.memory_space<vmem>>, vector<1x32xf32>
    %c0_3 = arith.constant 0 : index
    %c0_4 = arith.constant 0 : index
    %2 = vector.load %arg3[%c0_3, %c0_4] : memref<16x128xf32, #tpu.memory_space<vmem>>, vector<16x128xf32>
    %cst = arith.constant dense<0.000000e+00> : vector<1x128xf32>
    %3 = tpu.matmul %0, %2, %cst {dimension_numbers = #tpu.dot_dimension_numbers<[1], [0], [0], [1], [0, 0, 1, 1], [], []>, precision = #tpu.contract_precision<fp32>} : vector<1x16xf32>, vector<16x128xf32>, vector<1x128xf32> -> vector<1x128xf32>
    %c0_5 = arith.constant 0 : index
    %c0_6 = arith.constant 0 : index
    %4 = vector.load %arg4[%c0_5, %c0_6] : memref<32x128xf32, #tpu.memory_space<vmem>>, vector<32x128xf32>
    %cst_7 = arith.constant dense<0.000000e+00> : vector<1x128xf32>
    %5 = tpu.matmul %1, %4, %cst_7 {dimension_numbers = #tpu.dot_dimension_numbers<[1], [0], [0], [1], [0, 0, 1, 1], [], []>, precision = #tpu.contract_precision<fp32>} : vector<1x32xf32>, vector<32x128xf32>, vector<1x128xf32> -> vector<1x128xf32>
    %6 = arith.mulf %3, %5 : vector<1x128xf32>
    %c0_8 = arith.constant 0 : index
    %c0_9 = arith.constant 0 : index
    %7 = vector.load %arg5[%c0_8, %c0_9] : memref<1x128xf32, #tpu.memory_space<vmem>>, vector<1x128xf32>
    tpu.vector_store %arg5[%c0_8, %c0_9], %6 {strides = array<i32>} : memref<1x128xf32, #tpu.memory_space<vmem>>, vector<1x128xf32>,
    return
  }
  func.func @transform_0(%arg0: i32) -> (i32, i32) {
    %c0_i32 = arith.constant 0 : i32
    %c0_i32_0 = arith.constant 0 : i32
    return %arg0, %c0_i32 : i32, i32
  }
  func.func @transform_1(%arg0: i32) -> (i32, i32) {
    %c0_i32 = arith.constant 0 : i32
    %c0_i32_0 = arith.constant 0 : i32
    return %arg0, %c0_i32 : i32, i32
  }
  func.func @transform_2(%arg0: i32) -> (i32, i32) {
    %c0_i32 = arith.constant 0 : i32
    %c0_i32_0 = arith.constant 0 : i32
    %c0_i32_1 = arith.constant 0 : i32
    return %c0_i32, %c0_i32_0 : i32, i32
  }
  func.func @transform_3(%arg0: i32) -> (i32, i32) {
    %c0_i32 = arith.constant 0 : i32
    %c0_i32_0 = arith.constant 0 : i32
    %c0_i32_1 = arith.constant 0 : i32
    return %c0_i32, %c0_i32_0 : i32, i32
  }
  func.func @transform_4(%arg0: i32) -> (i32, i32) {
    %c0_i32 = arith.constant 0 : i32
    %c0_i32_0 = arith.constant 0 : i32
    return %arg0, %c0_i32 : i32, i32
  }
}

</mosaic_0001>

<bundles_post_ra>
// kernel: tpu_custom_call.1
= control target key start
LH: loop header
LB: loop body
LE: loop exit
PB: predicated region body
PF: predicated region fallthrough
CT: control target
= control target key end

     0   :  { %9 = vsyncpa [#allocation3], 0  ;;  %s1590_s0 = inlined_call_operand.hbm [shape: f32[1,16], index: 0, kind: input, shape index: {}]   ;;  %s1591_s1 = inlined_call_operand.vmem [shape: f32[1,32], index: 1, kind: input, shape index: {}]   ;;  %s1592_s2 = inlined_call_operand.hbm [shape: f32[16,128], index: 2, kind: input, shape index: {}]   ;;  %s1593_s3 = inlined_call_operand.hbm [shape: f32[32,128], index: 3, kind: input, shape index: {}]   ;;  %s1594_s4 = inlined_call_operand.hbm [shape: f32[1,128], index: 4, kind: output, shape index: {}]  }
   0x1   :  { %10 = vsyncpa [#allocation6], 0 }
   0x2   :  { %11 = vsyncpa [#allocation4], 0  ;;  %s1367_s15 = smov [#allocation5]   ;;  %s1273_s19 = scalar_lea.hbm %s1592_s2, 256 }
   0x3   :  { %s29_s16 = sshll.u32 %s1367_s15, 4  ;;  %p1274_p0 = scmp.ne.s32.totalorder %s1592_s2, %s1273_s19  ;;  %s30_s16 = int_to_ptr.vmem [resolvable:$true] %s29_s16 }
   0x4   :  { %p1277_p1 = scmp.lt.u32.totalorder %s1273_s19, %s1592_s2 }
   0x6   :  { %p1279_p2 = pnand %p1277_p1, %p1274_p0 }
   0x8   :  { %1282 = shalt.err (!%p1279_p2)
}
   0x9   :  { %s1283_s24 = scalar_lea.vmem %s30_s16, 256  ;;  %p1288_p4 = scmp.lt.s32.totalorder %s30_s16, %s30_s16 }
   0xa   :  { %p1284_p3 = scmp.ne.s32.totalorder %s30_s16, %s1283_s24  ;;  %p1289_p5 = scmp.lt.s32.totalorder %s1283_s24, %s1283_s24 }
   0xc   :  { %p1290_p6 = por %p1289_p5, %p1288_p4 }
   0xe   :  { %p1291_p7 = pnand %p1290_p6, %p1284_p3 }
  0x10   :  { %1294 = shalt.err (!%p1291_p7)
}
  0x11   :  { %s1368_s25 = smov 128   ;;  %s1369_s26 = smov 8  }
  0x12   :  { %35 = dma.hbm_to_vmem [thread:$0]  %s1592_s2, 256, %s30_s16, [#allocation6], %s1368_s25, %s1368_s25, %s1369_s26  }
  0x13   :  { %s1370_s29 = smov [#allocation2]   ;;  %s1371_s5 = smov [#allocation7]  }
  0x14   :  { %s18_s30 = sshll.u32 %s1370_s29, 4  ;;  %s41_s6 = sshll.u32 %s1371_s5, 4  ;;  %s19_s30 = int_to_ptr.vmem [resolvable:$true] %s18_s30  ;;  %s42_s6 = int_to_ptr.vmem [resolvable:$true] %s41_s6 }
  0x15   :  { %s1295_s9 = scalar_lea.hbm %s1590_s0, 16 }
  0x16   :  { %p1296_p8 = scmp.ne.s32.totalorder %s1590_s0, %s1295_s9  ;;  %p1299_p9 = scmp.lt.u32.totalorder %s1295_s9, %s1590_s0 }
  0x18   :  { %p1301_p10 = pnand %p1299_p9, %p1296_p8 }
  0x1a   :  { %1304 = shalt.err (!%p1301_p10)
}
  0x1b   :  { %s1305_s2 = scalar_lea.vmem %s19_s30, 16  ;;  %s1309_s14 = scalar_lea.vmem %s19_s30, 32 }
  0x1c   :  { %p1306_p11 = scmp.ne.s32.totalorder %s19_s30, %s1305_s2  ;;  %p1310_p12 = scmp.lt.s32.totalorder %s19_s30, %s19_s30 }
  0x1d   :  { %p1311_p13 = scmp.lt.s32.totalorder %s1309_s14, %s1305_s2 }
  0x1f   :  { %p1312_p0 = por %p1311_p13, %p1310_p12 }
  0x21   :  { %p1313_p1 = pnand %p1312_p0, %p1306_p11 }
  0x23   :  { %1316 = shalt.err (!%p1313_p1)
}
  0x24   :  { %21 = dma.hbm_to_vmem [thread:$0]  %s1590_s0, 16, %s19_s30, [#allocation3]  }
  0x25   :  { %s1317_s19 = scalar_lea.hbm %s1593_s3, 512 }
  0x26   :  { %p1318_p2 = scmp.ne.s32.totalorder %s1593_s3, %s1317_s19  ;;  %p1321_p3 = scmp.lt.u32.totalorder %s1317_s19, %s1593_s3 }
  0x28   :  { %p1323_p4 = pnand %p1321_p3, %p1318_p2 }
  0x2a   :  { %1326 = shalt.err (!%p1323_p4)
}
  0x2b   :  { %s1327_s24 = scalar_lea.vmem %s42_s6, 512  ;;  %p1332_p6 = scmp.lt.s32.totalorder %s42_s6, %s42_s6 }
  0x2c   :  { %p1328_p5 = scmp.ne.s32.totalorder %s42_s6, %s1327_s24  ;;  %p1333_p7 = scmp.lt.s32.totalorder %s1327_s24, %s1327_s24 }
  0x2e   :  { %p1334_p8 = por %p1333_p7, %p1332_p6 }
  0x30   :  { %p1335_p9 = pnand %p1334_p8, %p1328_p5 }
  0x32   :  { %1338 = shalt.err (!%p1335_p9)
}
  0x33   :  { %47 = dma.hbm_to_vmem [thread:$0]  %s1593_s3, 512, %s42_s6, [#allocation6], %s1368_s25, %s1368_s25, %s1369_s26  }
  0x34   :  { %1361 = dma.done.wait [#allocation3], 16  }
  0x35   :  { %1362 = vsyncadd [#allocation3], 4294967280 }
  0x36   :  { %1363 = dma.done.wait [#allocation6], 768  }
  0x37   :  { %1364 = vsyncadd [#allocation6], 4294966528  ;;  %v1372_v0 = vmov 0.0|0.0   ;;  %vm1373_vm0 = vmmov 0   ;;  %v1374_v1 = vmov 0.0   ;;  %vm61_vm1 = vcmask 130048  }
  0x38   :  { %1191 = vmatprep.subr.bf16.mxu0 %v1372_v0  ;;  %1087 = vmatprep.mubr.msk.f32.mxu0 %vm1373_vm0, %v1374_v1  ;;  %v59_v2 = vld [vmem:[#allocation5] sm:$0xff]  ;;  %v60_v3 = vld [vmem:[#allocation5 + $0x8] sm:$0xff]  ;;  %v57_v4 = vld [vmem:[#allocation2] sm:$0x1]  ;;  %vm528_vm2 = vcmask 261120  }
  0x39   :  { %1215 = vmatprep.subr.bf16.mxu1 %v1372_v0  ;;  %1144 = vmatprep.mubr.msk.f32.mxu1 %vm1373_vm0, %v1374_v1  ;;  %v66_v5 = vand.u32 4294901760, %v59_v2  ;;  %v69_v6 = vand.u32 4294901760, %v60_v3  ;;  %v63_v7 = vsel %vm61_vm1, %v57_v4, 0  ;;  %v1449_v8 = vld [vmem:[#allocation7] sm:$0xff]  ;;  %v1451_v9 = vld [vmem:[#allocation7 + $0x8] sm:$0xff]  ;;  %v1453_v10 = vld [vmem:[#allocation7 + $0x10] sm:$0xff] }
  0x3a   :  { %v1455_v11 = vand.u32 4294901760, %v63_v7  ;;  %v533_v12 = vand.u32 4294901760, %v1449_v8  ;;  %v536_v13 = vand.u32 4294901760, %v1451_v9  ;;  %v1459_v14 = vld [vmem:[#allocation7 + $0x18] sm:$0xff]  ;;  %v539_v15 = vand.u32 4294901760, %v1453_v10 }
  0x3b   :  { %v1462_v16 = vpack.c.bf16 %v69_v6, %v66_v5  ;;  %v1464_v17 = vsub.f32 %v59_v2, %v66_v5  ;;  %v1466_v18 = vsub.f32 %v60_v3, %v69_v6  ;;  %v542_v19 = vand.u32 4294901760, %v1459_v14  ;;  %v58_v47 = vld [vmem:[%s1591_s1] sm:$0x1]  ;;  %s1375_s1 = smov [#allocation8]  }
  0x3c   :  { %v1470_v20 = vsub.f32 %v63_v7, %v1455_v11  ;;  %v1475_v21 = vsub.f32 %v1449_v8, %v533_v12  ;;  %v1480_v22 = vsub.f32 %v1451_v9, %v536_v13  ;;  %v1485_v23 = vsub.f32 %v1453_v10, %v539_v15  ;;  %s1025_s26 = sshll.u32 %s1375_s1, 4  ;;  %s1026_s26 = int_to_ptr.vmem [resolvable:$true] %s1025_s26 }
  0x3d   :  { %1193 = vmatpush3.bf16.msra.mxu0 %v1462_v16  ;;  %v145_v24 = vand.u32 4294901760, %v1464_v17  ;;  %v152_v25 = vand.u32 4294901760, %v1466_v18  ;;  %v1493_v26 = vsub.f32 %v1459_v14, %v542_v19  ;;  %v530_v50 = vsel %vm528_vm2, %v58_v47, 0  ;;  %s1339_s28 = scalar_lea.vmem %s1026_s26, 16  ;;  %s1343_s29 = scalar_lea.vmem %s1026_s26, 32 }
  0x3e   :  { %v134_v27 = vand.u32 4294901760, %v1470_v20  ;;  %1194 = vmatprep.subr.bf16.mxu0 %v1372_v0  ;;  %v614_v28 = vand.u32 4294901760, %v1475_v21  ;;  %v621_v29 = vand.u32 4294901760, %v1480_v22  ;;  %v628_v30 = vand.u32 4294901760, %v1485_v23  ;;  %p1340_p10 = scmp.ne.s32.totalorder %s1026_s26, %s1339_s28  ;;  %p1344_p11 = scmp.lt.s32.totalorder %s1026_s26, %s1026_s26 }
  0x3f   :  { %v146_v31 = vsub.f32 %v1464_v17, %v145_v24  ;;  %v153_v32 = vsub.f32 %v1466_v18, %v152_v25  ;;  %v635_v33 = vand.u32 4294901760, %v1493_v26  ;;  %v601_v51 = vand.u32 4294901760, %v530_v50  ;;  %p1345_p12 = scmp.lt.s32.totalorder %s1343_s29, %s1339_s28 }
  0x40   :  { %v135_v34 = vsub.f32 %v1470_v20, %v134_v27  ;;  %v615_v35 = vsub.f32 %v1475_v21, %v614_v28  ;;  %v622_v36 = vsub.f32 %v1480_v22, %v621_v29  ;;  %v629_v37 = vsub.f32 %v1485_v23, %v628_v30 }
  0x41   :  { %v147_v38 = vand.u32 4294901760, %v146_v31  ;;  %v154_v39 = vand.u32 4294901760, %v153_v32  ;;  %v636_v40 = vsub.f32 %v1493_v26, %v635_v33  ;;  %v1198_v52 = vpack.c.bf16 %v1466_v18, %v1464_v17  ;;  %p1346_p13 = por %p1345_p12, %p1344_p11 }
  0x42   :  { %v136_v41 = vand.u32 4294901760, %v135_v34  ;;  %v616_v42 = vand.u32 4294901760, %v615_v35  ;;  %v623_v43 = vand.u32 4294901760, %v622_v36  ;;  %v630_v44 = vand.u32 4294901760, %v629_v37 }
  0x43   :  { %v1195_v45 = vpack.c.bf16 %v154_v39, %v147_v38  ;;  %v637_v46 = vand.u32 4294901760, %v636_v40  ;;  %v1222_v53 = vpack.c.bf16 %v1480_v22, %v1475_v21  ;;  %v1225_v54 = vpack.c.bf16 %v1493_v26, %v1485_v23  ;;  %p1347_p0 = pnand %p1346_p13, %p1340_p10 }
  0x44   :  { %1088 = vmatmul.mubr.f32.vlgmr.msra.gmra.mrb[0].mxu0 %v136_v41  ;;  %v1216_v48 = vpack.c.bf16 %v623_v43, %v616_v42  ;;  %v602_v55 = vsub.f32 %v530_v50, %v601_v51  ;;  %v1210_v56 = vpack.c.bf16 %v536_v13, %v533_v12  ;;  %v1213_v57 = vpack.c.bf16 %v542_v19, %v539_v15 }
  0x45   :  { %1196 = vmatpush3.bf16.msra.mxu0 %v1195_v45  ;;  %1094 = vmatprep.mubr.msk.f32.mxu0 %vm1373_vm0, %v1374_v1  ;;  %v1219_v49 = vpack.c.bf16 %v637_v46, %v630_v44  ;;  %v1204_v59 = vpack.c.bf16 %v152_v25, %v145_v24  ;;  %v1234_v60 = vpack.c.bf16 %v621_v29, %v614_v28 }
  0x46   :  { %1217 = vmatpush3.bf16.msra.mxu1 %v1216_v48  ;;  %1197 = vmatprep.subr.bf16.mxu0 %v1372_v0  ;;  %v603_v58 = vand.u32 4294901760, %v602_v55  ;;  %v1237_v61 = vpack.c.bf16 %v635_v33, %v628_v30 }
  0x47   :  { %1218 = vmatprep.subr.bf16.mxu1 %v1372_v0 }
  0x48   :  { %v604_v62 = vsub.f32 %v602_v55, %v603_v58 }
  0x4a   :  { %1220 = vmatpush3.bf16.msra.mxu1 %v1219_v49  ;;  %v605_v63 = vand.u32 4294901760, %v604_v62 }
  0x4b   :  { %1221 = vmatprep.subr.bf16.mxu1 %v1372_v0 }
  0x4c   :  { %1095 = vmatmul.mubr.f32.vlgmr.msra.gmra.mrb[0].mxu0 %v1455_v11 }
  0x4d   :  { %1145 = vmatmul.mubr.f32.vlgmr.msra.gmra.mrb[0].mxu1 %v601_v51  ;;  %1199 = vmatpush3.bf16.msra.mxu0 %v1198_v52 }
  0x4e   :  { %1223 = vmatpush3.bf16.msra.mxu1 %v1222_v53  ;;  %1101 = vmatprep.mubr.msk.f32.mxu0 %vm1373_vm0, %v1374_v1 }
  0x4f   :  { %1224 = vmatprep.subr.bf16.mxu1 %v1372_v0  ;;  %1155 = vmatprep.mubr.msk.f32.mxu1 %vm1373_vm0, %v1374_v1 }
  0x50   :  { %1200 = vmatprep.subr.bf16.mxu0 %v1372_v0 }
  0x52   :  { %1226 = vmatpush3.bf16.msra.mxu1 %v1225_v54 }
  0x53   :  { %1227 = vmatprep.subr.bf16.mxu1 %v1372_v0 }
  0x54   :  { %1102 = vmatmul.mubr.f32.vlgmr.msra.gmra.mrb[0].mxu0 %v1470_v20 }
  0x55   :  { %1156 = vmatmul.mubr.f32.vlgmr.msra.gmra.mrb[0].mxu1 %v602_v55  ;;  %1202 = vmatpush3.bf16.msra.mxu0 %v1462_v16 }
  0x56   :  { %1229 = vmatpush3.bf16.msra.mxu1 %v1210_v56  ;;  %1108 = vmatprep.mubr.msk.f32.mxu0 %vm1373_vm0, %v1374_v1 }
  0x57   :  { %1230 = vmatprep.subr.bf16.mxu1 %v1372_v0  ;;  %1166 = vmatprep.mubr.msk.f32.mxu1 %vm1373_vm0, %v1374_v1 }
  0x58   :  { %1203 = vmatprep.subr.bf16.mxu0 %v1372_v0 }
  0x5a   :  { %1232 = vmatpush3.bf16.msra.mxu1 %v1213_v57 }
  0x5b   :  { %1233 = vmatprep.subr.bf16.mxu1 %v1372_v0 }
  0x5c   :  { %1109 = vmatmul.mubr.f32.vlgmr.msra.gmra.mrb[0].mxu0 %v134_v27 }
  0x5d   :  { %1167 = vmatmul.mubr.f32.vlgmr.msra.gmra.mrb[0].mxu1 %v603_v58  ;;  %1205 = vmatpush3.bf16.msra.mxu0 %v1204_v59 }
  0x5e   :  { %1235 = vmatpush3.bf16.msra.mxu1 %v1234_v60  ;;  %1115 = vmatprep.mubr.msk.f32.mxu0 %vm1373_vm0, %v1374_v1 }
  0x5f   :  { %1236 = vmatprep.subr.bf16.mxu1 %v1372_v0  ;;  %1177 = vmatprep.mubr.msk.f32.mxu1 %vm1373_vm0, %v1374_v1 }
  0x60   :  { %1206 = vmatprep.subr.bf16.mxu0 %v1372_v0 }
  0x62   :  { %1238 = vmatpush3.bf16.msra.mxu1 %v1237_v61 }
  0x63   :  { %1239 = vmatprep.subr.bf16.mxu1 %v1372_v0 }
  0x64   :  { %1116 = vmatmul.mubr.f32.vlgmr.msra.gmra.mrb[0].mxu0 %v1455_v11 }
  0x65   :  { %1178 = vmatmul.mubr.f32.vlgmr.msra.gmra.mrb[0].mxu1 %v601_v51  ;;  %1208 = vmatpush3.bf16.msra.mxu0 %v1462_v16 }
  0x66   :  { %1241 = vmatpush3.bf16.msra.mxu1 %v1210_v56  ;;  %1122 = vmatprep.mubr.msk.f32.mxu0 %vm1373_vm0, %v1374_v1 }
  0x67   :  { %1242 = vmatprep.subr.bf16.mxu1 %v1372_v0  ;;  %1209 = vmatprep.subr.bf16.mxu0 %v1372_v0 }
  0x68   :  { %1188 = vmatprep.mubr.msk.f32.mxu1 %vm1373_vm0, %v1374_v1 }
  0x6a   :  { %1244 = vmatpush3.bf16.msra.mxu1 %v1213_v57 }
  0x6c   :  { %1123 = vmatmul.mubr.f32.vlgmr.msra.gmra.mrb[0].mxu0 %v1455_v11 }
  0x6d   :  { %1211 = vmatpush3.bf16.msra.mxu0 %v1210_v56  ;;  %1189 = vmatmul.mubr.f32.vlgmr.msra.gmra.mrb[0].mxu1 %v601_v51 }
  0x6e   :  { %1212 = vmatprep.subr.bf16.mxu0 %v1372_v0  ;;  %1133 = vmatprep.mubr.msk.f32.mxu0 %vm1373_vm0, %v1374_v1 }
  0x71   :  { %1214 = vmatpush3.bf16.msra.mxu0 %v1213_v57 }
  0x74   :  { %1134 = vmatmul.mubr.f32.vlgmr.msra.gmra.mrb[2].mxu0 %v605_v63 }
 0x13f   :  { %v520_v2 = vpop.f32.mrb[0].mxu0 }
 0x140   :  { %v1013_v3 = vpop.f32.mrb[0].mxu1  ;;  %v1124_v4 = vpop.f32.mrb[1].mxu0 }
 0x141   :  { %v1190_v5 = vpop.f32.mrb[1].mxu1 }
 0x147   :  { %v607_v6 = vpop.f32.mrb[2].mxu0 }
 0x148   :  { %v1245_v7 = vadd.f32 %v1013_v3, %v607_v6  ;;  %v1135_v8 = vpop.f32.mrb[3].mxu0 }
 0x14a   :  { %v1017_v9 = vmul.f32 %v1245_v7, %v520_v2 }
 0x14c   :  { %1018 = vst [vmem:[#allocation8] sm:$0x1] %v1017_v9 }
 0x14d   :  { %1350 = shalt.err (!%p1347_p0)
}
 0x14e   :  { %s1351_s6 = scalar_lea.hbm %s1594_s4, 16 }
 0x14f   :  { %p1352_p1 = scmp.ne.s32.totalorder %s1594_s4, %s1351_s6  ;;  %p1355_p2 = scmp.lt.u32.totalorder %s1351_s6, %s1594_s4 }
 0x151   :  { %p1357_p3 = pnand %p1355_p2, %p1352_p1 }
 0x153   :  { %1360 = shalt.err (!%p1357_p3)
}
 0x154   :  { %1028 = dma.vmem_to_hbm [thread:$0]  %s1026_s26, 16, %s1594_s4, [#allocation4]  }
 0x155   :  { %1365 = dma.done.wait [#allocation4], 16  }
 0x156   :  { %1366 = vsyncadd [#allocation4], 4294967280 }
 0x157   :  { %1032 = vsyncpa [#allocation3], 1 }
 0x158   :  { %1033 = vsyncpa [#allocation6], 1 }
 0x159   :  { %1034 = vsyncpa [#allocation4], 1 }

</bundles_post_ra>
